<compile_context>
chip_gen: v6e
topology: v6e:2x2x1
jax: 0.10.0
libtpu: 0.0.40
codegen_flags: <defaults>
</compile_context>

<pallas_src>
import jax
import jax.numpy as jnp
import numpy as np
from jax.experimental import pallas as pl
from jax.experimental.pallas import tpu as pltpu

# ---------------- configuration (small, consistent with the module) ----------
B      = 2          # batch
NCHAN  = 4          # EEG channels (conv2 kernel height)
NTIME  = 129        # time samples; must be >= 25 + 75 - 1 = 99
NCLASS = 3
NFILT  = 40         # nFilt_FirstLayer
K1     = 25         # conv1 temporal kernel (1, 25)
POOL   = 75         # AvgPool2d (1, 75)
STRIDE = 15         # AvgPool2d stride (1, 15)

T1   = NTIME - K1 + 1                 # width after conv1 (padding=0)      = 105
OUTW = (T1 - POOL) // STRIDE + 1      # width after avg pool               = 3
FEAT = NFILT * OUTW                   # flattened feature size (fSize[-1]) = 120
KC   = NCHAN * K1                     # fused contraction size             = 100
BT1  = B * T1                         # batch*time packed on the sublane axis

# Static pooling tensor: pool3[j, b, b'*T1 + t] = 1/75 iff b'==b and
# j*STRIDE <= t < j*STRIDE + POOL.  pool3[j] @ sq gives avg-pool column j for
# every (batch, filter) pair in one tiny matmul.
_POOL3 = np.zeros((OUTW, B, BT1), np.float32)
for _j in range(OUTW):
    for _b in range(B):
        _s = _b * T1 + _j * STRIDE
        _POOL3[_j, _b, _s:_s + POOL] = 1.0 / POOL


def _renorm(w, maxnorm=2.0):
    """torch.renorm(p=2, dim=0, maxnorm) for a conv weight (O, ...)."""
    flat = w.reshape(w.shape[0], -1)
    norms = jnp.sqrt(jnp.sum(flat * flat, axis=1))
    scale = jnp.where(norms > maxnorm, maxnorm / (norms + 1e-7), 1.0)
    return w * scale.reshape((-1,) + (1,) * (w.ndim - 1))


# ------------------------------ Pallas kernel --------------------------------
def shallow_convnet_kernel(patch_ref, wc_ref, shift_ref, pool_ref,
                           wl_ref, bl_ref, o_ref):
    # patch_ref : (B*T1, KC)        im2col patches, row = b*T1 + t, col = c*K1 + k
    # wc_ref    : (KC, NFILT)       fused conv1∘conv2 weight, BN scale folded in
    # shift_ref : (1, NFILT)        fused conv1-bias + BN shift
    # pool_ref  : (OUTW, B, B*T1)   per-output-column average-pool matrices
    # wl_ref    : (OUTW, NFILT, NCLASS)  linear weight, wl[j, f, n] = W[n, f*OUTW+j]
    # bl_ref    : (1, NCLASS)       linear bias
    # o_ref     : (B, NCLASS)       logits for the whole batch

    # Fused conv1 + conv2 + BN (eval): one MXU matmul over the whole batch.
    z = jnp.dot(patch_ref[...], wc_ref[...],
                preferred_element_type=jnp.float32)            # (B*T1, NFILT)
    z = z + shift_ref[...]                                     # BN shift (+ bias)
    sq = z * z                                                 # .pow(2)

    # AvgPool2d((1,75),stride 15) -> log -> Linear, fused per pooled column j.
    # Dropout(p=0.25) is identity in eval mode.
    acc = jnp.zeros((B, NCLASS), jnp.float32)
    for j in range(OUTW):                                      # OUTW = 3, unrolled
        feat_j = jnp.dot(pool_ref[j], sq,
                         preferred_element_type=jnp.float32)   # (B, NFILT)
        acc = acc + jnp.dot(jnp.log(feat_j), wl_ref[j],
                            preferred_element_type=jnp.float32)  # (B, NCLASS)

    o_ref[...] = (acc + bl_ref[...]).astype(o_ref.dtype)       # single store


# ------------------------------ wrapper / glue --------------------------------
@jax.jit
def shallow_convnet_forward(x_nchw, params):
    """x_nchw: (B, 1, NCHAN, NTIME) float32. Returns (B, NCLASS) logits."""
    (w1, b1, w2, gamma, beta, rmean, rvar, wlin, blin) = params

    # Conv2dWithConstraint weight renorm (p=2, dim=0, maxnorm=2).
    # TODO(synk): training-mode BatchNorm statistics update / Dropout masking
    # are not implemented (eval-mode forward only).
    w1 = _renorm(w1, 2.0)                 # (NFILT, 1, 1, K1)
    w2 = _renorm(w2, 2.0)                 # (NFILT, NFILT, NCHAN, 1)

    w1k = w1[:, 0, 0, :]                  # (NFILT, K1)           [g, k]
    w2k = w2[:, :, :, 0]                  # (NFILT, NFILT, NCHAN) [f, g, c]

    # Fuse conv1∘conv2: Wc[f, c*K1+k] = sum_g w2[f,g,c] * w1[g,k]
    wc = jnp.einsum('fgc,gk->fck', w2k, w1k).reshape(NFILT, KC)   # (NFILT, 100)
    # Fold conv1 bias through conv2: b_eff[f] = sum_c sum_g w2[f,g,c] * b1[g]
    b_eff = jnp.einsum('fgc,g->f', w2k, b1)                       # (NFILT,)

    # Fuse eval-mode BatchNorm: scale into Wc, shift carries bias/mean/beta.
    eps = 1e-5
    bn_scale = gamma / jnp.sqrt(rvar + eps)                       # (NFILT,)
    wc_t = (wc * bn_scale[:, None]).T                             # (KC, NFILT)
    shift = (beta + (b_eff - rmean) * bn_scale).reshape(1, NFILT)

    # im2col patches with batch*time packed on the sublane axis:
    # patches[b*T1+t, c*K1+k] = x[b, c, t+k]
    x = x_nchw[:, 0]                                              # (B, NCHAN, NTIME)
    gather_idx = jnp.arange(K1)[:, None] + jnp.arange(T1)[None, :]  # (K1, T1)
    win = x[:, :, gather_idx]                                     # (B, NCHAN, K1, T1)
    patches = jnp.transpose(win, (0, 3, 1, 2)).reshape(BT1, KC)

    # Linear weight rearranged so column j of the pooled map has its own
    # (NFILT, NCLASS) slice: wl3[j, f, n] = wlin[n, f*OUTW + j] (view(B,-1) order).
    wl3 = jnp.transpose(wlin.reshape(NCLASS, NFILT, OUTW), (2, 1, 0))
    bl2 = blin.reshape(1, NCLASS)
    pool3 = jnp.asarray(_POOL3)                                   # (OUTW, B, B*T1)

    out = pl.pallas_call(
        shallow_convnet_kernel,
        out_shape=jax.ShapeDtypeStruct((B, NCLASS), jnp.float32),
        grid_spec=pltpu.PrefetchScalarGridSpec(
            num_scalar_prefetch=0,
            grid=(1,),                                  # whole batch, one step
            in_specs=[
                pl.BlockSpec((BT1, KC), lambda i: (0, 0)),
                pl.BlockSpec((KC, NFILT), lambda i: (0, 0)),
                pl.BlockSpec((1, NFILT), lambda i: (0, 0)),
                pl.BlockSpec((OUTW, B, BT1), lambda i: (0, 0, 0)),
                pl.BlockSpec((OUTW, NFILT, NCLASS), lambda i: (0, 0, 0)),
                pl.BlockSpec((1, NCLASS), lambda i: (0, 0)),
            ],
            out_specs=pl.BlockSpec((B, NCLASS), lambda i: (0, 0)),
        ),
        compiler_params=pltpu.CompilerParams(
            dimension_semantics=("arbitrary",)),
    )(patches, wc_t, shift, pool3, wl3, bl2)
    return out


# ------------------------------ pure-JAX reference ---------------------------
def reference_forward(x_nchw, params):
    """Faithful (unfused) eval-mode forward of the PyTorch module."""
    (w1, b1, w2, gamma, beta, rmean, rvar, wlin, blin) = params
    w1 = _renorm(w1, 2.0)
    w2 = _renorm(w2, 2.0)
    xc = x_nchw[:, 0]                                       # (B, C, T)
    # conv1 (1,25) with bias
    y1 = jnp.zeros((B, NFILT, NCHAN, T1), jnp.float32)
    for k in range(K1):
        y1 = y1 + w1[None, :, 0, 0, k, None, None] * xc[:, None, :, k:k + T1]
    y1 = y1 + b1[None, :, None, None]
    # conv2 (nChan,1), no bias
    y2 = jnp.einsum('fgc,bgct->bft', w2[:, :, :, 0], y1)    # (B, F, T1)
    # BatchNorm2d (eval, running stats)
    eps = 1e-5
    y2 = (y2 - rmean[None, :, None]) / jnp.sqrt(rvar[None, :, None] + eps)
    y2 = y2 * gamma[None, :, None] + beta[None, :, None]
    # square -> avgpool -> log
    sq = y2 * y2
    cols = [jnp.mean(sq[:, :, j * STRIDE:j * STRIDE + POOL], axis=2)
            for j in range(OUTW)]
    feat = jnp.log(jnp.stack(cols, axis=2))                 # (B, F, OUTW)
    flat = feat.reshape(B, FEAT)                            # matches view(B,-1)
    return flat @ wlin.T + blin[None, :]


# ---------------------------------- main --------------------------------------
if __name__ == "__main__":
    key = jax.random.PRNGKey(0)
    ks = jax.random.split(key, 8)

    w1 = 0.1 * jax.random.normal(ks[0], (NFILT, 1, 1, K1), jnp.float32)
    b1 = 0.1 * jax.random.normal(ks[1], (NFILT,), jnp.float32)
    w2 = 0.1 * jax.random.normal(ks[2], (NFILT, NFILT, NCHAN, 1), jnp.float32)
    gamma = 1.0 + 0.05 * jax.random.normal(ks[3], (NFILT,), jnp.float32)
    beta = 0.05 * jax.random.normal(ks[4], (NFILT,), jnp.float32)
    rmean = 0.05 * jax.random.normal(ks[5], (NFILT,), jnp.float32)
    rvar = jnp.ones((NFILT,), jnp.float32) + 0.1 * jax.random.uniform(ks[6], (NFILT,))
    wlin = 0.1 * jax.random.normal(ks[7], (NCLASS, FEAT), jnp.float32)
    blin = 0.1 * jnp.arange(NCLASS, dtype=jnp.float32)
    params = (w1, b1, w2, gamma, beta, rmean, rvar, wlin, blin)

    x = jax.random.normal(jax.random.PRNGKey(1), (B, 1, NCHAN, NTIME), jnp.float32)

    out = shallow_convnet_forward(x, params)
    out = jax.block_until_ready(out)

    ref = reference_forward(x, params)
    np.testing.assert_allclose(np.asarray(out), np.asarray(ref),
                               rtol=2e-4, atol=2e-4)
    print("KERNEL_OK")
</pallas_src>

<mosaic_0001>
module attributes {stable_mosaic.version = 11 : i64} {
  func.func @shallow_convnet_kernel(%arg0: i32, %arg1: memref<210x100xf32, #tpu.memory_space<vmem>>, %arg2: memref<100x40xf32, #tpu.memory_space<vmem>>, %arg3: memref<1x40xf32, #tpu.memory_space<vmem>>, %arg4: memref<3x2x210xf32, #tpu.memory_space<vmem>>, %arg5: memref<3x40x3xf32, #tpu.memory_space<vmem>>, %arg6: memref<1x3xf32, #tpu.memory_space<vmem>>, %arg7: memref<2x3xf32, #tpu.memory_space<vmem>>) attributes {dimension_semantics = [#tpu.dimension_semantics<arbitrary>], iteration_bounds = array<i64: 1>, scalar_prefetch = 0 : i64, scratch_operands = 0 : i64, tpu.core_type = #tpu.core_type<tc>, window_params = [{pipeline_mode = #tpu.pipeline_mode<synchronous>, transform_indices = @transform_0, window_bounds = array<i64: 210, 100>}, {pipeline_mode = #tpu.pipeline_mode<synchronous>, transform_indices = @transform_1, window_bounds = array<i64: 100, 40>}, {pipeline_mode = #tpu.pipeline_mode<synchronous>, transform_indices = @transform_2, window_bounds = array<i64: 1, 40>}, {pipeline_mode = #tpu.pipeline_mode<synchronous>, transform_indices = @transform_3, window_bounds = array<i64: 3, 2, 210>}, {pipeline_mode = #tpu.pipeline_mode<synchronous>, transform_indices = @transform_4, window_bounds = array<i64: 3, 40, 3>}, {pipeline_mode = #tpu.pipeline_mode<synchronous>, transform_indices = @transform_5, window_bounds = array<i64: 1, 3>}, {pipeline_mode = #tpu.pipeline_mode<synchronous>, transform_indices = @transform_6, window_bounds = array<i64: 2, 3>}]} {
    %c0 = arith.constant 0 : index
    %c0_0 = arith.constant 0 : index
    %0 = vector.load %arg1[%c0, %c0_0] : memref<210x100xf32, #tpu.memory_space<vmem>>, vector<210x100xf32>
    %c0_1 = arith.constant 0 : index
    %c0_2 = arith.constant 0 : index
    %1 = vector.load %arg2[%c0_1, %c0_2] : memref<100x40xf32, #tpu.memory_space<vmem>>, vector<100x40xf32>
    %cst = arith.constant dense<0.000000e+00> : vector<210x40xf32>
    %2 = tpu.matmul %0, %1, %cst {dimension_numbers = #tpu.dot_dimension_numbers<[1], [0], [0], [1], [0, 0, 1, 1], [], []>} : vector<210x100xf32>, vector<100x40xf32>, vector<210x40xf32> -> vector<210x40xf32>
    %c0_3 = arith.constant 0 : index
    %c0_4 = arith.constant 0 : index
    %3 = vector.load %arg3[%c0_3, %c0_4] : memref<1x40xf32, #tpu.memory_space<vmem>>, vector<1x40xf32>
    %4 = vector.broadcast %3 : vector<1x40xf32> to vector<210x40xf32>
    %5 = arith.addf %2, %4 : vector<210x40xf32>
    %6 = arith.mulf %5, %5 : vector<210x40xf32>
    %cst_5 = arith.constant 0.000000e+00 : f32
    %7 = vector.broadcast %cst_5 : f32 to vector<2x3xf32>
    %c0_6 = arith.constant 0 : index
    %c0_7 = arith.constant 0 : index
    %c0_8 = arith.constant 0 : index
    %8 = vector.load %arg4[%c0_6, %c0_7, %c0_8] : memref<3x2x210xf32, #tpu.memory_space<vmem>>, vector<1x2x210xf32>
    %9 = vector.shape_cast %8 : vector<1x2x210xf32> to vector<2x210xf32>
    %cst_9 = arith.constant dense<0.000000e+00> : vector<2x40xf32>
    %10 = tpu.matmul %9, %6, %cst_9 {dimension_numbers = #tpu.dot_dimension_numbers<[1], [0], [0], [1], [0, 0, 1, 1], [], []>} : vector<2x210xf32>, vector<210x40xf32>, vector<2x40xf32> -> vector<2x40xf32>
    %11 = math.log %10 : vector<2x40xf32>
    %c0_10 = arith.constant 0 : index
    %c0_11 = arith.constant 0 : index
    %c0_12 = arith.constant 0 : index
    %12 = vector.load %arg5[%c0_10, %c0_11, %c0_12] : memref<3x40x3xf32, #tpu.memory_space<vmem>>, vector<1x40x3xf32>
    %13 = vector.shape_cast %12 : vector<1x40x3xf32> to vector<40x3xf32>
    %cst_13 = arith.constant dense<0.000000e+00> : vector<2x3xf32>
    %14 = tpu.matmul %11, %13, %cst_13 {dimension_numbers = #tpu.dot_dimension_numbers<[1], [0], [0], [1], [0, 0, 1, 1], [], []>} : vector<2x40xf32>, vector<40x3xf32>, vector<2x3xf32> -> vector<2x3xf32>
    %15 = arith.addf %7, %14 : vector<2x3xf32>
    %c1 = arith.constant 1 : index
    %c0_14 = arith.constant 0 : index
    %c0_15 = arith.constant 0 : index
    %16 = vector.load %arg4[%c1, %c0_14, %c0_15] : memref<3x2x210xf32, #tpu.memory_space<vmem>>, vector<1x2x210xf32>
    %17 = vector.shape_cast %16 : vector<1x2x210xf32> to vector<2x210xf32>
    %cst_16 = arith.constant dense<0.000000e+00> : vector<2x40xf32>
    %18 = tpu.matmul %17, %6, %cst_16 {dimension_numbers = #tpu.dot_dimension_numbers<[1], [0], [0], [1], [0, 0, 1, 1], [], []>} : vector<2x210xf32>, vector<210x40xf32>, vector<2x40xf32> -> vector<2x40xf32>
    %19 = math.log %18 : vector<2x40xf32>
    %c1_17 = arith.constant 1 : index
    %c0_18 = arith.constant 0 : index
    %c0_19 = arith.constant 0 : index
    %20 = vector.load %arg5[%c1_17, %c0_18, %c0_19] : memref<3x40x3xf32, #tpu.memory_space<vmem>>, vector<1x40x3xf32>
    %21 = vector.shape_cast %20 : vector<1x40x3xf32> to vector<40x3xf32>
    %cst_20 = arith.constant dense<0.000000e+00> : vector<2x3xf32>
    %22 = tpu.matmul %19, %21, %cst_20 {dimension_numbers = #tpu.dot_dimension_numbers<[1], [0], [0], [1], [0, 0, 1, 1], [], []>} : vector<2x40xf32>, vector<40x3xf32>, vector<2x3xf32> -> vector<2x3xf32>
    %23 = arith.addf %15, %22 : vector<2x3xf32>
    %c2 = arith.constant 2 : index
    %c0_21 = arith.constant 0 : index
    %c0_22 = arith.constant 0 : index
    %24 = vector.load %arg4[%c2, %c0_21, %c0_22] : memref<3x2x210xf32, #tpu.memory_space<vmem>>, vector<1x2x210xf32>
    %25 = vector.shape_cast %24 : vector<1x2x210xf32> to vector<2x210xf32>
    %cst_23 = arith.constant dense<0.000000e+00> : vector<2x40xf32>
    %26 = tpu.matmul %25, %6, %cst_23 {dimension_numbers = #tpu.dot_dimension_numbers<[1], [0], [0], [1], [0, 0, 1, 1], [], []>} : vector<2x210xf32>, vector<210x40xf32>, vector<2x40xf32> -> vector<2x40xf32>
    %27 = math.log %26 : vector<2x40xf32>
    %c2_24 = arith.constant 2 : index
    %c0_25 = arith.constant 0 : index
    %c0_26 = arith.constant 0 : index
    %28 = vector.load %arg5[%c2_24, %c0_25, %c0_26] : memref<3x40x3xf32, #tpu.memory_space<vmem>>, vector<1x40x3xf32>
    %29 = vector.shape_cast %28 : vector<1x40x3xf32> to vector<40x3xf32>
    %cst_27 = arith.constant dense<0.000000e+00> : vector<2x3xf32>
    %30 = tpu.matmul %27, %29, %cst_27 {dimension_numbers = #tpu.dot_dimension_numbers<[1], [0], [0], [1], [0, 0, 1, 1], [], []>} : vector<2x40xf32>, vector<40x3xf32>, vector<2x3xf32> -> vector<2x3xf32>
    %31 = arith.addf %23, %30 : vector<2x3xf32>
    %c0_28 = arith.constant 0 : index
    %c0_29 = arith.constant 0 : index
    %32 = vector.load %arg6[%c0_28, %c0_29] : memref<1x3xf32, #tpu.memory_space<vmem>>, vector<1x3xf32>
    %33 = vector.broadcast %32 : vector<1x3xf32> to vector<2x3xf32>
    %34 = arith.addf %31, %33 : vector<2x3xf32>
    %c0_30 = arith.constant 0 : index
    %c0_31 = arith.constant 0 : index
    %35 = vector.load %arg7[%c0_30, %c0_31] : memref<2x3xf32, #tpu.memory_space<vmem>>, vector<2x3xf32>
    tpu.vector_store %arg7[%c0_30, %c0_31], %34 {strides = array<i32>} : memref<2x3xf32, #tpu.memory_space<vmem>>, vector<2x3xf32>,
    return
  }
  func.func @transform_0(%arg0: i32) -> (i32, i32) {
    %c0_i32 = arith.constant 0 : i32
    %c0_i32_0 = arith.constant 0 : i32
    %c0_i32_1 = arith.constant 0 : i32
    return %c0_i32, %c0_i32_0 : i32, i32
  }
  func.func @transform_1(%arg0: i32) -> (i32, i32) {
    %c0_i32 = arith.constant 0 : i32
    %c0_i32_0 = arith.constant 0 : i32
    %c0_i32_1 = arith.constant 0 : i32
    return %c0_i32, %c0_i32_0 : i32, i32
  }
  func.func @transform_2(%arg0: i32) -> (i32, i32) {
    %c0_i32 = arith.constant 0 : i32
    %c0_i32_0 = arith.constant 0 : i32
    %c0_i32_1 = arith.constant 0 : i32
    return %c0_i32, %c0_i32_0 : i32, i32
  }
  func.func @transform_3(%arg0: i32) -> (i32, i32, i32) {
    %c0_i32 = arith.constant 0 : i32
    %c0_i32_0 = arith.constant 0 : i32
    %c0_i32_1 = arith.constant 0 : i32
    %c0_i32_2 = arith.constant 0 : i32
    return %c0_i32, %c0_i32_0, %c0_i32_1 : i32, i32, i32
  }
  func.func @transform_4(%arg0: i32) -> (i32, i32, i32) {
    %c0_i32 = arith.constant 0 : i32
    %c0_i32_0 = arith.constant 0 : i32
    %c0_i32_1 = arith.constant 0 : i32
    %c0_i32_2 = arith.constant 0 : i32
    return %c0_i32, %c0_i32_0, %c0_i32_1 : i32, i32, i32
  }
  func.func @transform_5(%arg0: i32) -> (i32, i32) {
    %c0_i32 = arith.constant 0 : i32
    %c0_i32_0 = arith.constant 0 : i32
    %c0_i32_1 = arith.constant 0 : i32
    return %c0_i32, %c0_i32_0 : i32, i32
  }
  func.func @transform_6(%arg0: i32) -> (i32, i32) {
    %c0_i32 = arith.constant 0 : i32
    %c0_i32_0 = arith.constant 0 : i32
    %c0_i32_1 = arith.constant 0 : i32
    return %c0_i32, %c0_i32_0 : i32, i32
  }
}

</mosaic_0001>

<bundles_post_ra>
// kernel: shallow_convnet_forward.1
= control target key start
LH: loop header
LB: loop body
LE: loop exit
PB: predicated region body
PF: predicated region fallthrough
CT: control target
= control target key end

     0   :  { %vm153_vm0 = vcmask 1043456   ;;  %v1197_v1 = vmov 0.0   ;;  %vm1198_vm1 = vmmov 0   ;;  %s1841_s0 = inlined_call_operand.vmem [shape: f32[210,100], index: 0, kind: input, shape index: {}]   ;;  %s1842_s1 = inlined_call_operand.vmem [shape: f32[100,40], index: 1, kind: input, shape index: {}]   ;;  %s1843_s2 = inlined_call_operand.vmem [shape: f32[1,40], index: 2, kind: input, shape index: {}]   ;;  %s1844_s3 = inlined_call_operand.vmem [shape: f32[3,2,210], index: 3, kind: input, shape index: {}]   ;;  %s1845_s4 = inlined_call_operand.vmem [shape: f32[3,40,3], index: 4, kind: input, shape index: {}]   ;;  %s1846_s5 = inlined_call_operand.vmem [shape: f32[1,3], index: 5, kind: input, shape index: {}]   ;;  %s1847_s6 = inlined_call_operand.hbm [shape: f32[2,3], index: 6, kind: output, shape index: {}]  }
   0x1   :  { %v63_v0 = vld [vmem:[%s1842_s1 + $0x60] sm:$0xf]  ;;  %1020 = vmatprep.subr.mxu0 %v1197_v1  ;;  %v62_v2 = vld [vmem:[%s1842_s1 + $0x58] sm:$0xff]  ;;  %402 = vmatprep.subr.mxu1 %v1197_v1  ;;  %v61_v3 = vld [vmem:[%s1842_s1 + $0x50] sm:$0xff] }
   0x2   :  { %1021 = vmatpush3.msk.msra.mxu0 %vm153_vm0, %v63_v0  ;;  %1046 = vmatprep.mubr.msk.f32.mxu0 %vm1198_vm1, %v1197_v1  ;;  %v60_v4 = vld [vmem:[%s1842_s1 + $0x48] sm:$0xff]  ;;  %v59_v5 = vld [vmem:[%s1842_s1 + $0x40] sm:$0xff]  ;;  %v58_v6 = vld [vmem:[%s1842_s1 + $0x38] sm:$0xff] }
   0x3   :  { %1022 = vmatprep.subr.mxu0 %v1197_v1  ;;  %v57_v7 = vld [vmem:[%s1842_s1 + $0x30] sm:$0xff]  ;;  %v56_v8 = vld [vmem:[%s1842_s1 + $0x28] sm:$0xff] }
   0x4   :  { %1023 = vmatpush3.msra.mxu0 %v62_v2 }
   0x5   :  { %1024 = vmatprep.subr.mxu0 %v1197_v1 }
   0x6   :  { %1025 = vmatpush3.msra.mxu0 %v61_v3 }
   0x7   :  { %1026 = vmatprep.subr.mxu0 %v1197_v1 }
   0x8   :  { %1027 = vmatpush3.msra.mxu0 %v60_v4 }
   0x9   :  { %1028 = vmatprep.subr.mxu0 %v1197_v1 }
   0xa   :  { %1029 = vmatpush3.msra.mxu0 %v59_v5 }
   0xb   :  { %1030 = vmatprep.subr.mxu0 %v1197_v1 }
   0xc   :  { %1031 = vmatpush3.msra.mxu0 %v58_v6 }
   0xd   :  { %1032 = vmatprep.subr.mxu0 %v1197_v1 }
   0xe   :  { %11 = vsyncpa [#allocation3], 0  ;;  %1033 = vmatpush3.msra.mxu0 %v57_v7  ;;  %v55_v9 = vld [vmem:[%s1842_s1 + $0x20] sm:$0xff]  ;;  %v54_v10 = vld [vmem:[%s1842_s1 + $0x18] sm:$0xff]  ;;  %vm71_vm2 = vcmask 818176   ;;  %vm395_vm3 = vcmask 670720  }
   0xf   :  { %1034 = vmatprep.subr.mxu0 %v1197_v1  ;;  %v53_v11 = vld [vmem:[%s1842_s1 + $0x10] sm:$0xff]  ;;  %v52_v12 = vld [vmem:[%s1842_s1 + $0x8] sm:$0xff]  ;;  %v51_v13 = vld [vmem:[%s1842_s1] sm:$0xff]  ;;  %vm398_vm4 = vcmask 1041408   ;;  %vm571_vm5 = vcmask 326656   ;;  %s1199_s11 = smov [#allocation2]  }
  0x10   :  { %1035 = vmatpush3.msra.mxu0 %v56_v8  ;;  %v24_v14 = vld [vmem:[%s1841_s0] sm:$0xff]  ;;  %v25_v15 = vld [vmem:[%s1841_s0 + $0x8] sm:$0xff]  ;;  %v26_v16 = vld [vmem:[%s1841_s0 + $0x10] sm:$0xff]  ;;  %s900_s12 = sshll.u32 %s1199_s11, 4  ;;  %vm892_vm6 = vcmask 17408   ;;  %s901_s12 = int_to_ptr.vmem [resolvable:$true] %s900_s12 }
  0x11   :  { %1036 = vmatprep.subr.mxu0 %v1197_v1  ;;  %v27_v17 = vld [vmem:[%s1841_s0 + $0x18] sm:$0xff]  ;;  %v28_v18 = vld [vmem:[%s1841_s0 + $0x20] sm:$0xff]  ;;  %v29_v19 = vld [vmem:[%s1841_s0 + $0x28] sm:$0xff]  ;;  %p1180_p1 = scmp.lt.s32.totalorder %s901_s12, %s901_s12 }
  0x12   :  { %1037 = vmatpush3.msra.mxu0 %v55_v9  ;;  %v30_v20 = vld [vmem:[%s1841_s0 + $0x30] sm:$0xff]  ;;  %v31_v21 = vld [vmem:[%s1841_s0 + $0x38] sm:$0xff]  ;;  %v32_v22 = vld [vmem:[%s1841_s0 + $0x40] sm:$0xff] }
  0x13   :  { %1038 = vmatprep.subr.mxu0 %v1197_v1  ;;  %v33_v23 = vld [vmem:[%s1841_s0 + $0x48] sm:$0xff]  ;;  %v34_v24 = vld [vmem:[%s1841_s0 + $0x50] sm:$0xff]  ;;  %v35_v25 = vld [vmem:[%s1841_s0 + $0x58] sm:$0xff] }
  0x14   :  { %1039 = vmatpush3.msra.mxu0 %v54_v10  ;;  %v36_v26 = vld [vmem:[%s1841_s0 + $0x60] sm:$0xff]  ;;  %v37_v27 = vld [vmem:[%s1841_s0 + $0x68] sm:$0xff]  ;;  %v38_v28 = vld [vmem:[%s1841_s0 + $0x70] sm:$0xff] }
  0x15   :  { %1040 = vmatprep.subr.mxu0 %v1197_v1  ;;  %v39_v29 = vld [vmem:[%s1841_s0 + $0x78] sm:$0xff]  ;;  %v40_v30 = vld [vmem:[%s1841_s0 + $0x80] sm:$0xff]  ;;  %v41_v31 = vld [vmem:[%s1841_s0 + $0x88] sm:$0xff] }
  0x16   :  { %1041 = vmatpush3.msra.mxu0 %v53_v11  ;;  %v42_v32 = vld [vmem:[%s1841_s0 + $0x90] sm:$0xff]  ;;  %v43_v33 = vld [vmem:[%s1841_s0 + $0x98] sm:$0xff]  ;;  %v44_v34 = vld [vmem:[%s1841_s0 + $0xa0] sm:$0xff] }
  0x17   :  { %1042 = vmatprep.subr.mxu0 %v1197_v1  ;;  %v45_v35 = vld [vmem:[%s1841_s0 + $0xa8] sm:$0xff]  ;;  %v46_v36 = vld [vmem:[%s1841_s0 + $0xb0] sm:$0xff]  ;;  %v47_v37 = vld [vmem:[%s1841_s0 + $0xb8] sm:$0xff] }
  0x18   :  { %1043 = vmatpush3.msra.mxu0 %v52_v12  ;;  %v48_v38 = vld [vmem:[%s1841_s0 + $0xc0] sm:$0xff]  ;;  %v49_v39 = vld [vmem:[%s1841_s0 + $0xc8] sm:$0xff]  ;;  %v50_v40 = vld [vmem:[%s1841_s0 + $0xd0] sm:$0x3] }
  0x19   :  { %1044 = vmatprep.subr.mxu0 %v1197_v1  ;;  %v1454_v41 = vld.sshfl [vmem:[%s1844_s3] sm:$0x33 pattern:$0x76325410] }
  0x1a   :  { %1045 = vmatpush3.msra.mxu0 %v51_v13  ;;  %v393_v42 = vcombine.high %v1454_v41, %v1454_v41  ;;  %v1476_v9 = vld.sshfl [vmem:[%s1844_s3 + $0x8] sm:$0x33 pattern:$0x76325410]  ;;  %v1484_v12 = vld [vmem:[%s1843_s2] ss:$0 sm:$0xff] }
  0x1b   :  { %1047 = vmatmul.mubr.msk.f32.vlgmr.msra.gmra.mxu0 %vm71_vm2, %v24_v14  ;;  %732 = vmatprep.subr.mxu0 %v1197_v1  ;;  %v728_v10 = vcombine.high %v1476_v9, %v1476_v9 }
  0x1c   :  { %1049 = vmatprep.mubr.msk.f32.mxu0 %vm1198_vm1, %v1197_v1  ;;  %939 = vmatprep.mubr.msk.f32.mxu1 %vm395_vm3, %v393_v42 }
  0x1f   :  { %1050 = vmatmul.mubr.msk.f32.gmra.mxu0 %vm71_vm2, %v25_v15 }
  0x20   :  { %1052 = vmatprep.mubr.msk.f32.mxu0 %vm1198_vm1, %v1197_v1 }
  0x23   :  { %1053 = vmatmul.mubr.msk.f32.gmra.mxu0 %vm71_vm2, %v26_v16 }
  0x24   :  { %1055 = vmatprep.mubr.msk.f32.mxu0 %vm1198_vm1, %v1197_v1 }
  0x27   :  { %1056 = vmatmul.mubr.msk.f32.gmra.mxu0 %vm71_vm2, %v27_v17 }
  0x28   :  { %1058 = vmatprep.mubr.msk.f32.mxu0 %vm1198_vm1, %v1197_v1 }
  0x2b   :  { %1059 = vmatmul.mubr.msk.f32.gmra.mxu0 %vm71_vm2, %v28_v18 }
  0x2c   :  { %1061 = vmatprep.mubr.msk.f32.mxu0 %vm1198_vm1, %v1197_v1 }
  0x2f   :  { %1062 = vmatmul.mubr.msk.f32.gmra.mxu0 %vm71_vm2, %v29_v19 }
  0x30   :  { %1064 = vmatprep.mubr.msk.f32.mxu0 %vm1198_vm1, %v1197_v1 }
  0x33   :  { %1065 = vmatmul.mubr.msk.f32.gmra.mxu0 %vm71_vm2, %v30_v20 }
  0x34   :  { %1067 = vmatprep.mubr.msk.f32.mxu0 %vm1198_vm1, %v1197_v1 }
  0x37   :  { %1068 = vmatmul.mubr.msk.f32.gmra.mxu0 %vm71_vm2, %v31_v21 }
  0x38   :  { %1070 = vmatprep.mubr.msk.f32.mxu0 %vm1198_vm1, %v1197_v1 }
  0x3b   :  { %1071 = vmatmul.mubr.msk.f32.gmra.mxu0 %vm71_vm2, %v32_v22 }
  0x3c   :  { %1073 = vmatprep.mubr.msk.f32.mxu0 %vm1198_vm1, %v1197_v1 }
  0x3f   :  { %1074 = vmatmul.mubr.msk.f32.gmra.mxu0 %vm71_vm2, %v33_v23 }
  0x40   :  { %1076 = vmatprep.mubr.msk.f32.mxu0 %vm1198_vm1, %v1197_v1 }
  0x43   :  { %1077 = vmatmul.mubr.msk.f32.gmra.mxu0 %vm71_vm2, %v34_v24 }
  0x44   :  { %1079 = vmatprep.mubr.msk.f32.mxu0 %vm1198_vm1, %v1197_v1 }
  0x47   :  { %1080 = vmatmul.mubr.msk.f32.gmra.mxu0 %vm71_vm2, %v35_v25 }
  0x48   :  { %1082 = vmatprep.mubr.msk.f32.mxu0 %vm1198_vm1, %v1197_v1 }
  0x4b   :  { %1083 = vmatmul.mubr.msk.f32.gmra.mxu0 %vm71_vm2, %v36_v26 }
  0x4c   :  { %1085 = vmatprep.mubr.msk.f32.mxu0 %vm1198_vm1, %v1197_v1 }
  0x4f   :  { %1086 = vmatmul.mubr.msk.f32.gmra.mxu0 %vm71_vm2, %v37_v27 }
  0x50   :  { %1088 = vmatprep.mubr.msk.f32.mxu0 %vm1198_vm1, %v1197_v1 }
  0x53   :  { %1089 = vmatmul.mubr.msk.f32.gmra.mxu0 %vm71_vm2, %v38_v28 }
  0x54   :  { %1091 = vmatprep.mubr.msk.f32.mxu0 %vm1198_vm1, %v1197_v1 }
  0x57   :  { %1092 = vmatmul.mubr.msk.f32.gmra.mxu0 %vm71_vm2, %v39_v29 }
  0x58   :  { %1094 = vmatprep.mubr.msk.f32.mxu0 %vm1198_vm1, %v1197_v1 }
  0x5b   :  { %1095 = vmatmul.mubr.msk.f32.gmra.mxu0 %vm71_vm2, %v40_v30 }
  0x5c   :  { %1097 = vmatprep.mubr.msk.f32.mxu0 %vm1198_vm1, %v1197_v1 }
  0x5f   :  { %1098 = vmatmul.mubr.msk.f32.gmra.mxu0 %vm71_vm2, %v41_v31 }
  0x60   :  { %1100 = vmatprep.mubr.msk.f32.mxu0 %vm1198_vm1, %v1197_v1 }
  0x63   :  { %1101 = vmatmul.mubr.msk.f32.gmra.mxu0 %vm71_vm2, %v42_v32 }
  0x64   :  { %1103 = vmatprep.mubr.msk.f32.mxu0 %vm1198_vm1, %v1197_v1 }
  0x67   :  { %1104 = vmatmul.mubr.msk.f32.gmra.mxu0 %vm71_vm2, %v43_v33 }
  0x68   :  { %1106 = vmatprep.mubr.msk.f32.mxu0 %vm1198_vm1, %v1197_v1 }
  0x6b   :  { %1107 = vmatmul.mubr.msk.f32.gmra.mxu0 %vm71_vm2, %v44_v34 }
  0x6c   :  { %1109 = vmatprep.mubr.msk.f32.mxu0 %vm1198_vm1, %v1197_v1 }
  0x6f   :  { %1110 = vmatmul.mubr.msk.f32.gmra.mxu0 %vm71_vm2, %v45_v35 }
  0x70   :  { %1112 = vmatprep.mubr.msk.f32.mxu0 %vm1198_vm1, %v1197_v1 }
  0x73   :  { %1113 = vmatmul.mubr.msk.f32.gmra.mxu0 %vm71_vm2, %v46_v36 }
  0x74   :  { %1115 = vmatprep.mubr.msk.f32.mxu0 %vm1198_vm1, %v1197_v1 }
  0x77   :  { %1116 = vmatmul.mubr.msk.f32.gmra.mxu0 %vm71_vm2, %v47_v37 }
  0x78   :  { %1118 = vmatprep.mubr.msk.f32.mxu0 %vm1198_vm1, %v1197_v1 }
  0x7b   :  { %1119 = vmatmul.mubr.msk.f32.gmra.mxu0 %vm71_vm2, %v48_v38 }
  0x7c   :  { %1121 = vmatprep.mubr.msk.f32.mxu0 %vm1198_vm1, %v1197_v1 }
  0x7f   :  { %1122 = vmatmul.mubr.msk.f32.gmra.mxu0 %vm71_vm2, %v49_v39 }
  0x80   :  { %1124 = vmatprep.mubr.msk.f32.mxu0 %vm1198_vm1, %v1197_v1 }
  0x83   :  { %1125 = vmatmul.mubr.msk.f32.gmra.mxu0 %vm71_vm2, %v50_v40 }
  0x84   :  { %954 = vmatprep.mubr.msk.f32.mxu0 %vm395_vm3, %v728_v10 }
  0xdb   :  { %v1458_v43 = vpop.f32.mrf.mxu0 }
  0xdd   :  { %v1048_v44 = vpop.f32.mrf.mxu0 }
  0xdf   :  { %v1461_v45 = vpop.f32.mrf.mxu0 }
  0xe1   :  { %v1051_v46 = vpop.f32.mrf.mxu0 }
  0xe3   :  { %v1463_v47 = vpop.f32.mrf.mxu0 }
  0xe5   :  { %v1054_v48 = vpop.f32.mrf.mxu0 }
  0xe7   :  { %v1465_v49 = vpop.f32.mrf.mxu0 }
  0xe9   :  { %v1057_v50 = vpop.f32.mrf.mxu0 }
  0xeb   :  { %v1467_v51 = vpop.f32.mrf.mxu0 }
  0xec   :  { %v244_v48 = vadd.f32 %v1484_v12, %v1467_v51 }
  0xed   :  { %v1060_v52 = vpop.f32.mrf.mxu0 }
  0xef   :  { %v1469_v53 = vpop.f32.mrf.mxu0 }
  0xf0   :  { %v249_v42 = vadd.f32 %v1484_v12, %v1469_v53  ;;  %v239_v53 = vadd.f32 %v1484_v12, %v1465_v49 }
  0xf1   :  { %v1063_v54 = vpop.f32.mrf.mxu0 }
  0xf2   :  { %v1569_v54 = vmul.f32 %v249_v42, %v249_v42 }
  0xf3   :  { %v1471_v55 = vpop.f32.mrf.mxu0 }
  0xf4   :  { %v254_v38 = vadd.f32 %v1484_v12, %v1471_v55  ;;  %v234_v55 = vadd.f32 %v1484_v12, %v1463_v47 }
  0xf5   :  { %v1066_v56 = vpop.f32.mrf.mxu0 }
  0xf6   :  { %v1561_v50 = vmul.f32 %v254_v38, %v254_v38  ;;  %v1579_v56 = vmul.f32 %v244_v48, %v244_v48  ;;  %v477_v48 = vld [vmem:[%s1845_s4 + $0x18] sm:$0xff] }
  0xf7   :  { %v258_v57 = vpop.f32.mrf.mxu0 }
  0xf8   :  { %v259_v35 = vadd.f32 %v1484_v12, %v258_v57  ;;  %v229_v57 = vadd.f32 %v1484_v12, %v1461_v45 }
  0xf9   :  { %v1069_v58 = vpop.f32.mrf.mxu0 }
  0xfa   :  { %v1551_v44 = vmul.f32 %v259_v35, %v259_v35  ;;  %v1587_v58 = vmul.f32 %v239_v53, %v239_v53 }
  0xfb   :  { %v263_v59 = vpop.f32.mrf.mxu0 }
  0xfc   :  { %v264_v32 = vadd.f32 %v1484_v12, %v263_v59  ;;  %v224_v59 = vadd.f32 %v1484_v12, %v1458_v43 }
  0xfd   :  { %v1072_v60 = vpop.f32.mrf.mxu0 }
  0xfe   :  { %v1543_v39 = vmul.f32 %v264_v32, %v264_v32  ;;  %v1595_v60 = vmul.f32 %v234_v55, %v234_v55  ;;  %v1607_v43 = vmul.f32 %v224_v59, %v224_v59  ;;  %v959_v55 = vld [vmem:[%s1845_s4 + $0x70] sm:$0xff] }
  0xff   :  { %v268_v61 = vpop.f32.mrf.mxu0  ;;  %v955_v59 = vld [vmem:[%s1845_s4 + $0x50] sm:$0xff] }
 0x100   :  { %v269_v29 = vadd.f32 %v1484_v12, %v268_v61  ;;  %v1601_v61 = vmul.f32 %v229_v57, %v229_v57 }
 0x101   :  { %v1075_v62 = vpop.f32.mrf.mxu0 }
 0x102   :  { %v1533_v36 = vmul.f32 %v269_v29, %v269_v29 }
 0x103   :  { %v273_v63 = vpop.f32.mrf.mxu0 }
 0x104   :  { %v274_v26 = vadd.f32 %v1484_v12, %v273_v63 }
 0x105   :  { %v1078_v0 = vpop.f32.mrf.mxu0 }
 0x106   :  { %v1526_v33 = vmul.f32 %v274_v26, %v274_v26 }
 0x107   :  { %v278_v2 = vpop.f32.mrf.mxu0 }
 0x108   :  { %v279_v23 = vadd.f32 %v1484_v12, %v278_v2 }
 0x109   :  { %v1081_v3 = vpop.f32.mrf.mxu0 }
 0x10a   :  { %v1517_v30 = vmul.f32 %v279_v23, %v279_v23 }
 0x10b   :  { %v283_v4 = vpop.f32.mrf.mxu0 }
 0x10c   :  { %v284_v20 = vadd.f32 %v1484_v12, %v283_v4 }
 0x10d   :  { %v1084_v5 = vpop.f32.mrf.mxu0 }
 0x10e   :  { %v1510_v27 = vmul.f32 %v284_v20, %v284_v20 }
 0x10f   :  { %v288_v6 = vpop.f32.mrf.mxu0 }
 0x110   :  { %v289_v17 = vadd.f32 %v1484_v12, %v288_v6 }
 0x111   :  { %v1087_v7 = vpop.f32.mrf.mxu0 }
 0x112   :  { %v1501_v24 = vmul.f32 %v289_v17, %v289_v17 }
 0x113   :  { %v293_v8 = vpop.f32.mrf.mxu0 }
 0x114   :  { %v294_v14 = vadd.f32 %v1484_v12, %v293_v8 }
 0x115   :  { %v1090_v11 = vpop.f32.mrf.mxu0 }
 0x116   :  { %v1494_v21 = vmul.f32 %v294_v14, %v294_v14 }
 0x117   :  { %v298_v13 = vpop.f32.mrf.mxu0 }
 0x118   :  { %v299_v15 = vadd.f32 %v1484_v12, %v298_v13 }
 0x119   :  { %v1093_v16 = vpop.f32.mrf.mxu0 }
 0x11a   :  { %v1489_v18 = vmul.f32 %v299_v15, %v299_v15 }
 0x11b   :  { %v1491_v19 = vpop.f32.mrf.mxu0 }
 0x11c   :  { %403 = vmatpush1.msra.mxu1 %v1489_v18  ;;  %733 = vmatpush1.msra.mxu0 %v1489_v18 }
 0x11d   :  { %v1096_v22 = vpop.f32.mrf.mxu0  ;;  %404 = vmatprep.subr.mxu1 %v1197_v1  ;;  %734 = vmatprep.subr.mxu0 %v1197_v1 }
 0x11e   :  { %405 = vmatpush1.msra.mxu1 %v1494_v21  ;;  %735 = vmatpush1.msra.mxu0 %v1494_v21 }
 0x11f   :  { %v1505_v25 = vpop.f32.mrf.mxu0  ;;  %406 = vmatprep.subr.mxu1 %v1197_v1  ;;  %736 = vmatprep.subr.mxu0 %v1197_v1 }
 0x120   :  { %407 = vmatpush1.msra.mxu1 %v1501_v24  ;;  %737 = vmatpush1.msra.mxu0 %v1501_v24 }
 0x121   :  { %v1099_v28 = vpop.f32.mrf.mxu0  ;;  %408 = vmatprep.subr.mxu1 %v1197_v1  ;;  %738 = vmatprep.subr.mxu0 %v1197_v1 }
 0x122   :  { %409 = vmatpush1.msra.mxu1 %v1510_v27  ;;  %739 = vmatpush1.msra.mxu0 %v1510_v27 }
 0x123   :  { %v1521_v31 = vpop.f32.mrf.mxu0  ;;  %410 = vmatprep.subr.mxu1 %v1197_v1  ;;  %740 = vmatprep.subr.mxu0 %v1197_v1 }
 0x124   :  { %411 = vmatpush1.msra.mxu1 %v1517_v30  ;;  %741 = vmatpush1.msra.mxu0 %v1517_v30  ;;  %v314_v29 = vadd.f32 %v1484_v12, %v1521_v31  ;;  %v304_v31 = vadd.f32 %v1484_v12, %v1491_v19 }
 0x125   :  { %v1102_v34 = vpop.f32.mrf.mxu0  ;;  %412 = vmatprep.subr.mxu1 %v1197_v1  ;;  %742 = vmatprep.subr.mxu0 %v1197_v1 }
 0x126   :  { %413 = vmatpush1.msra.mxu1 %v1526_v33  ;;  %743 = vmatpush1.msra.mxu0 %v1526_v33  ;;  %v309_v34 = vadd.f32 %v1484_v12, %v1505_v25  ;;  %v1689_v25 = vld.sshfl [vmem:[%s1844_s3 + $0x4] sm:$0x33 pattern:$0x76325410] }
 0x127   :  { %v1537_v37 = vpop.f32.mrf.mxu0  ;;  %414 = vmatprep.subr.mxu1 %v1197_v1  ;;  %744 = vmatprep.subr.mxu0 %v1197_v1  ;;  %v489_v19 = vcombine.high %v1689_v25, %v1689_v25 }
 0x128   :  { %415 = vmatpush1.msra.mxu1 %v1533_v36  ;;  %745 = vmatpush1.msra.mxu0 %v1533_v36  ;;  %v319_v26 = vadd.f32 %v1484_v12, %v1537_v37  ;;  %v1680_v37 = vmul.f32 %v314_v29, %v314_v29  ;;  %v1691_v38 = vmul.f32 %v309_v34, %v309_v34 }
 0x129   :  { %v1105_v40 = vpop.f32.mrf.mxu0  ;;  %416 = vmatprep.subr.mxu1 %v1197_v1  ;;  %746 = vmatprep.subr.mxu0 %v1197_v1 }
 0x12a   :  { %417 = vmatpush1.msra.mxu1 %v1543_v39  ;;  %747 = vmatpush1.msra.mxu0 %v1543_v39  ;;  %v1672_v35 = vmul.f32 %v319_v26, %v319_v26 }
 0x12b   :  { %v1555_v46 = vpop.f32.mrf.mxu0  ;;  %418 = vmatprep.subr.mxu1 %v1197_v1  ;;  %748 = vmatprep.subr.mxu0 %v1197_v1 }
 0x12c   :  { %419 = vmatpush1.msra.mxu1 %v1551_v44  ;;  %749 = vmatpush1.msra.mxu0 %v1551_v44  ;;  %v324_v22 = vadd.f32 %v1484_v12, %v1555_v46  ;;  %v478_v46 = vld [vmem:[%s1845_s4 + $0x20] sm:$0xff] }
 0x12d   :  { %v1108_v52 = vpop.f32.mrf.mxu0  ;;  %420 = vmatprep.subr.mxu1 %v1197_v1  ;;  %750 = vmatprep.subr.mxu0 %v1197_v1 }
 0x12e   :  { %421 = vmatpush1.msra.mxu1 %v1561_v50  ;;  %751 = vmatpush1.msra.mxu0 %v1561_v50  ;;  %v1664_v32 = vmul.f32 %v324_v22, %v324_v22  ;;  %v475_v52 = vld [vmem:[%s1845_s4 + $0x8] sm:$0xff] }
 0x12f   :  { %v1573_v51 = vpop.f32.mrf.mxu0  ;;  %422 = vmatprep.subr.mxu1 %v1197_v1  ;;  %752 = vmatprep.subr.mxu0 %v1197_v1 }
 0x130   :  { %423 = vmatpush1.msra.mxu1 %v1569_v54  ;;  %753 = vmatpush1.msra.mxu0 %v1569_v54  ;;  %v329_v17 = vadd.f32 %v1484_v12, %v1573_v51 }
 0x131   :  { %v1111_v49 = vpop.f32.mrf.mxu0  ;;  %424 = vmatprep.subr.mxu1 %v1197_v1  ;;  %754 = vmatprep.subr.mxu0 %v1197_v1 }
 0x132   :  { %425 = vmatpush1.msra.mxu1 %v1579_v56  ;;  %755 = vmatpush1.msra.mxu0 %v1579_v56  ;;  %v1656_v28 = vmul.f32 %v329_v17, %v329_v17  ;;  %v957_v49 = vld [vmem:[%s1845_s4 + $0x60] sm:$0xff] }
 0x133   :  { %v333_v47 = vpop.f32.mrf.mxu0  ;;  %426 = vmatprep.subr.mxu1 %v1197_v1  ;;  %756 = vmatprep.subr.mxu0 %v1197_v1 }
 0x134   :  { %427 = vmatpush1.msra.mxu1 %v1587_v58  ;;  %757 = vmatpush1.msra.mxu0 %v1587_v58  ;;  %v334_v15 = vadd.f32 %v1484_v12, %v333_v47 }
 0x135   :  { %v1114_v45 = vpop.f32.mrf.mxu0  ;;  %428 = vmatprep.subr.mxu1 %v1197_v1  ;;  %758 = vmatprep.subr.mxu0 %v1197_v1 }
 0x136   :  { %429 = vmatpush1.msra.mxu1 %v1595_v60  ;;  %759 = vmatpush1.msra.mxu0 %v1595_v60  ;;  %v1648_v23 = vmul.f32 %v334_v15, %v334_v15 }
 0x137   :  { %v338_v62 = vpop.f32.mrf.mxu0  ;;  %430 = vmatprep.subr.mxu1 %v1197_v1  ;;  %760 = vmatprep.subr.mxu0 %v1197_v1 }
 0x138   :  { %431 = vmatpush1.msra.mxu1 %v1601_v61  ;;  %761 = vmatpush1.msra.mxu0 %v1601_v61  ;;  %v339_v13 = vadd.f32 %v1484_v12, %v338_v62 }
 0x139   :  { %v1117_v63 = vpop.f32.mrf.mxu0  ;;  %432 = vmatprep.subr.mxu1 %v1197_v1  ;;  %762 = vmatprep.subr.mxu0 %v1197_v1 }
 0x13a   :  { %433 = vmatpush1.msra.mxu1 %v1607_v43  ;;  %763 = vmatpush1.msra.mxu0 %v1607_v43  ;;  %v1640_v20 = vmul.f32 %v339_v13, %v339_v13 }
 0x13b   :  { %v343_v0 = vpop.f32.mrf.mxu0  ;;  %444 = vmatprep.subr.mxu1 %v1197_v1  ;;  %774 = vmatprep.subr.mxu0 %v1197_v1 }
 0x13c   :  { %v344_v10 = vadd.f32 %v1484_v12, %v343_v0  ;;  %v961_v0 = vld [vmem:[%s1846_s5] ss:$0 sm:$0xff] }
 0x13d   :  { %v1120_v2 = vpop.f32.mrf.mxu0 }
 0x13e   :  { %v1632_v16 = vmul.f32 %v344_v10, %v344_v10 }
 0x13f   :  { %v348_v3 = vpop.f32.mrf.mxu0 }
 0x140   :  { %v349_v6 = vadd.f32 %v1484_v12, %v348_v3 }
 0x141   :  { %v1123_v4 = vpop.f32.mrf.mxu0 }
 0x142   :  { %v1623_v14 = vmul.f32 %v349_v6, %v349_v6 }
 0x143   :  { %v353_v5 = vpop.f32.mrf.mxu0 }
 0x144   :  { %v354_v7 = vadd.f32 %v1484_v12, %v353_v5  ;;  %v1697_v12 = vmul.f32 %v304_v31, %v304_v31 }
 0x145   :  { %v1126_v8 = vpop.f32.mrf.mxu0 }
 0x146   :  { %v1620_v11 = vmul.f32 %v354_v7, %v354_v7 }
 0x148   :  { %938 = vmatpush2.msk.msra.mxu1 %vm398_vm4, %v1620_v11  ;;  %953 = vmatpush2.msk.msra.mxu0 %vm398_vm4, %v1620_v11 }
 0x149   :  { %446 = vmatprep.subr.mxu1 %v1197_v1  ;;  %776 = vmatprep.subr.mxu0 %v1197_v1 }
 0x14a   :  { %447 = vmatpush2.msra.mxu1 %v1623_v14  ;;  %777 = vmatpush2.msra.mxu0 %v1623_v14 }
 0x14b   :  { %448 = vmatprep.subr.mxu1 %v1197_v1  ;;  %778 = vmatprep.subr.mxu0 %v1197_v1 }
 0x14c   :  { %449 = vmatpush2.msra.mxu1 %v1632_v16  ;;  %779 = vmatpush2.msra.mxu0 %v1632_v16 }
 0x14d   :  { %450 = vmatprep.subr.mxu1 %v1197_v1  ;;  %780 = vmatprep.subr.mxu0 %v1197_v1 }
 0x14e   :  { %451 = vmatpush2.msra.mxu1 %v1640_v20  ;;  %781 = vmatpush2.msra.mxu0 %v1640_v20 }
 0x14f   :  { %452 = vmatprep.subr.mxu1 %v1197_v1  ;;  %782 = vmatprep.subr.mxu0 %v1197_v1 }
 0x150   :  { %453 = vmatpush2.msra.mxu1 %v1648_v23  ;;  %783 = vmatpush2.msra.mxu0 %v1648_v23 }
 0x151   :  { %454 = vmatprep.subr.mxu1 %v1197_v1  ;;  %784 = vmatprep.subr.mxu0 %v1197_v1 }
 0x152   :  { %455 = vmatpush2.msra.mxu1 %v1656_v28  ;;  %785 = vmatpush2.msra.mxu0 %v1656_v28 }
 0x153   :  { %456 = vmatprep.subr.mxu1 %v1197_v1  ;;  %786 = vmatprep.subr.mxu0 %v1197_v1 }
 0x154   :  { %457 = vmatpush2.msra.mxu1 %v1664_v32  ;;  %787 = vmatpush2.msra.mxu0 %v1664_v32 }
 0x155   :  { %458 = vmatprep.subr.mxu1 %v1197_v1  ;;  %788 = vmatprep.subr.mxu0 %v1197_v1 }
 0x156   :  { %459 = vmatpush2.msra.mxu1 %v1672_v35  ;;  %789 = vmatpush2.msra.mxu0 %v1672_v35 }
 0x157   :  { %460 = vmatprep.subr.mxu1 %v1197_v1  ;;  %790 = vmatprep.subr.mxu0 %v1197_v1 }
 0x158   :  { %461 = vmatpush2.msra.mxu1 %v1680_v37  ;;  %791 = vmatpush2.msra.mxu0 %v1680_v37 }
 0x159   :  { %462 = vmatprep.subr.mxu1 %v1197_v1  ;;  %792 = vmatprep.subr.mxu0 %v1197_v1 }
 0x15a   :  { %463 = vmatpush2.msra.mxu1 %v1691_v38  ;;  %793 = vmatpush2.msra.mxu0 %v1691_v38 }
 0x15b   :  { %464 = vmatprep.subr.mxu1 %v1197_v1  ;;  %794 = vmatprep.subr.mxu0 %v1197_v1 }
 0x15c   :  { %465 = vmatpush2.msra.mxu1 %v1697_v12  ;;  %795 = vmatpush2.msra.mxu0 %v1697_v12 }
 0x15d   :  { %467 = vmatmul.mubr.f32.vlgmr.msra.gmra.mxu1 %v1454_v41  ;;  %493 = vmatprep.subr.mxu1 %v1197_v1  ;;  %v948_v41 = vld [vmem:[%s1845_s4 + $0x48] sm:$0xff] }
 0x15e   :  { %494 = vmatpush1.msra.mxu1 %v1489_v18  ;;  %943 = vmatprep.mubr.msk.f32.mxu1 %vm395_vm3, %v489_v19  ;;  %v946_v18 = vld [vmem:[%s1845_s4 + $0x38] sm:$0xff] }
 0x15f   :  { %495 = vmatprep.subr.mxu1 %v1197_v1  ;;  %797 = vmatmul.mubr.f32.vlgmr.msra.gmra.mxu0 %v1476_v9  ;;  %v947_v9 = vld [vmem:[%s1845_s4 + $0x40] sm:$0xff] }
 0x160   :  { %496 = vmatpush1.msra.mxu1 %v1494_v21  ;;  %v945_v21 = vld [vmem:[%s1845_s4 + $0x30] sm:$0xff] }
 0x161   :  { %497 = vmatprep.subr.mxu1 %v1197_v1 }
 0x162   :  { %498 = vmatpush1.msra.mxu1 %v1501_v24  ;;  %v944_v24 = vld [vmem:[%s1845_s4 + $0x28] sm:$0xff] }
 0x163   :  { %499 = vmatprep.subr.mxu1 %v1197_v1 }
 0x164   :  { %500 = vmatpush1.msra.mxu1 %v1510_v27 }
 0x165   :  { %501 = vmatprep.subr.mxu1 %v1197_v1 }
 0x166   :  { %502 = vmatpush1.msra.mxu1 %v1517_v30 }
 0x167   :  { %503 = vmatprep.subr.mxu1 %v1197_v1 }
 0x168   :  { %504 = vmatpush1.msra.mxu1 %v1526_v33 }
 0x169   :  { %505 = vmatprep.subr.mxu1 %v1197_v1 }
 0x16a   :  { %506 = vmatpush1.msra.mxu1 %v1533_v36 }
 0x16b   :  { %507 = vmatprep.subr.mxu1 %v1197_v1 }
 0x16c   :  { %508 = vmatpush1.msra.mxu1 %v1543_v39 }
 0x16d   :  { %509 = vmatprep.subr.mxu1 %v1197_v1 }
 0x16e   :  { %510 = vmatpush1.msra.mxu1 %v1551_v44 }
 0x16f   :  { %511 = vmatprep.subr.mxu1 %v1197_v1 }
 0x170   :  { %512 = vmatpush1.msra.mxu1 %v1561_v50  ;;  %v476_v50 = vld [vmem:[%s1845_s4 + $0x10] sm:$0xff] }
 0x171   :  { %513 = vmatprep.subr.mxu1 %v1197_v1 }
 0x172   :  { %514 = vmatpush1.msra.mxu1 %v1569_v54  ;;  %v474_v54 = vld [vmem:[%s1845_s4] sm:$0xff] }
 0x173   :  { %515 = vmatprep.subr.mxu1 %v1197_v1 }
 0x174   :  { %516 = vmatpush1.msra.mxu1 %v1579_v56  ;;  %v958_v56 = vld [vmem:[%s1845_s4 + $0x68] sm:$0xff] }
 0x175   :  { %517 = vmatprep.subr.mxu1 %v1197_v1 }
 0x176   :  { %518 = vmatpush1.msra.mxu1 %v1587_v58  ;;  %v956_v58 = vld [vmem:[%s1845_s4 + $0x58] sm:$0xff]  ;;  %s1175_s4 = scalar_lea.vmem %s901_s12, 32 }
 0x177   :  { %519 = vmatprep.subr.mxu1 %v1197_v1  ;;  %p1176_p0 = scmp.ne.s32.totalorder %s901_s12, %s1175_s4  ;;  %p1181_p2 = scmp.lt.s32.totalorder %s1175_s4, %s1175_s4 }
 0x178   :  { %520 = vmatpush1.msra.mxu1 %v1595_v60 }
 0x179   :  { %521 = vmatprep.subr.mxu1 %v1197_v1  ;;  %p1182_p3 = por %p1181_p2, %p1180_p1 }
 0x17a   :  { %522 = vmatpush1.msra.mxu1 %v1601_v61 }
 0x17b   :  { %523 = vmatprep.subr.mxu1 %v1197_v1  ;;  %p1183_p4 = pnand %p1182_p3, %p1176_p0 }
 0x17c   :  { %524 = vmatpush1.msra.mxu1 %v1607_v43 }
 0x17d   :  { %535 = vmatprep.subr.mxu1 %v1197_v1 }
 0x17e   :  { %942 = vmatpush2.msk.msra.mxu1 %vm398_vm4, %v1620_v11 }
 0x17f   :  { %537 = vmatprep.subr.mxu1 %v1197_v1 }
 0x180   :  { %538 = vmatpush2.msra.mxu1 %v1623_v14 }
 0x181   :  { %539 = vmatprep.subr.mxu1 %v1197_v1 }
 0x182   :  { %540 = vmatpush2.msra.mxu1 %v1632_v16 }
 0x183   :  { %541 = vmatprep.subr.mxu1 %v1197_v1 }
 0x184   :  { %542 = vmatpush2.msra.mxu1 %v1640_v20 }
 0x185   :  { %543 = vmatprep.subr.mxu1 %v1197_v1 }
 0x186   :  { %544 = vmatpush2.msra.mxu1 %v1648_v23 }
 0x187   :  { %545 = vmatprep.subr.mxu1 %v1197_v1 }
 0x188   :  { %546 = vmatpush2.msra.mxu1 %v1656_v28 }
 0x189   :  { %547 = vmatprep.subr.mxu1 %v1197_v1 }
 0x18a   :  { %548 = vmatpush2.msra.mxu1 %v1664_v32 }
 0x18b   :  { %549 = vmatprep.subr.mxu1 %v1197_v1 }
 0x18c   :  { %550 = vmatpush2.msra.mxu1 %v1672_v35 }
 0x18d   :  { %551 = vmatprep.subr.mxu1 %v1197_v1 }
 0x18e   :  { %552 = vmatpush2.msra.mxu1 %v1680_v37 }
 0x18f   :  { %553 = vmatprep.subr.mxu1 %v1197_v1 }
 0x190   :  { %554 = vmatpush2.msra.mxu1 %v1691_v38 }
 0x191   :  { %555 = vmatprep.subr.mxu1 %v1197_v1 }
 0x192   :  { %556 = vmatpush2.msra.mxu1 %v1697_v12 }
 0x193   :  { %558 = vmatmul.mubr.f32.vlgmr.msra.gmra.mxu1 %v1689_v25  ;;  %1127 = vmatprep.subr.mxu1 %v1197_v1 }
 0x194   :  { %1137 = vmatprep.mubr.msk.f32.mxu1 %vm1198_vm1, %v1197_v1  ;;  %1128 = vmatpush3.msra.mxu1 %v948_v41 }
 0x195   :  { %1129 = vmatprep.subr.mxu1 %v1197_v1 }
 0x196   :  { %1130 = vmatpush3.msra.mxu1 %v947_v9 }
 0x197   :  { %1131 = vmatprep.subr.mxu1 %v1197_v1 }
 0x198   :  { %1132 = vmatpush3.msra.mxu1 %v946_v18 }
 0x199   :  { %1133 = vmatprep.subr.mxu1 %v1197_v1 }
 0x19a   :  { %1134 = vmatpush3.msra.mxu1 %v945_v21 }
 0x19b   :  { %1135 = vmatprep.subr.mxu1 %v1197_v1 }
 0x19c   :  { %1136 = vmatpush3.msra.mxu1 %v944_v24 }
 0x19d   :  { %1140 = vmatprep.subr.mxu1 %v1197_v1 }
 0x21d   :  { %v468_v27 = vpop.f32.mrf.mxu1 }
 0x21f   :  { %v470_v30 = vpop.f32.mrf.mxu1  ;;  %v798_v33 = vpop.f32.mrf.mxu0 }
 0x221   :  { %v800_v36 = vpop.f32.mrf.mxu0 }
 0x253   :  { %v559_v39 = vpop.f32.mrf.mxu1 }
 0x254   :  { %1169 = vlog2.f32 %v559_v39 }
 0x255   :  { %v561_v40 = vpop.f32.mrf.mxu1  ;;  %1171 = vlog2.f32 %v468_v27 }
 0x256   :  { %1173 = vlog2.f32 %v798_v33 }
 0x261   :  { %v1170_v42 = vpop.eup %1169 }
 0x262   :  { %v564_v44 = vmul.f32 0.6931472, %v1170_v42  ;;  %v1172_v53 = vpop.eup %1171 }
 0x263   :  { %v473_v51 = vmul.f32 0.6931472, %v1172_v53  ;;  %v1174_v57 = vpop.eup %1173 }
 0x264   :  { %1138 = vmatmul.mubr.msk.f32.vlgmr.msra.gmra.mxu1 %vm571_vm5, %v564_v44  ;;  %v803_v47 = vmul.f32 0.6931472, %v1174_v57 }
 0x265   :  { %1141 = vmatpush3.msra.mxu1 %v478_v46  ;;  %1150 = vmatprep.mubr.msk.f32.mxu1 %vm1198_vm1, %v1197_v1 }
 0x266   :  { %1142 = vmatprep.subr.mxu1 %v1197_v1 }
 0x267   :  { %1143 = vmatpush3.msra.mxu1 %v477_v48 }
 0x268   :  { %1144 = vmatprep.subr.mxu1 %v1197_v1 }
 0x269   :  { %1145 = vmatpush3.msra.mxu1 %v476_v50 }
 0x26a   :  { %1146 = vmatprep.subr.mxu1 %v1197_v1 }
 0x26b   :  { %1147 = vmatpush3.msra.mxu1 %v475_v52 }
 0x26c   :  { %1148 = vmatprep.subr.mxu1 %v1197_v1 }
 0x26d   :  { %1149 = vmatpush3.msra.mxu1 %v474_v54 }
 0x26e   :  { %1151 = vmatmul.mubr.msk.f32.vlgmr.msra.gmra.mxu1 %vm571_vm5, %v473_v51  ;;  %1153 = vmatprep.subr.mxu1 %v1197_v1 }
 0x26f   :  { %1154 = vmatpush3.msra.mxu1 %v959_v55  ;;  %1163 = vmatprep.mubr.msk.f32.mxu1 %vm1198_vm1, %v1197_v1 }
 0x270   :  { %1155 = vmatprep.subr.mxu1 %v1197_v1 }
 0x271   :  { %1156 = vmatpush3.msra.mxu1 %v958_v56 }
 0x272   :  { %1157 = vmatprep.subr.mxu1 %v1197_v1 }
 0x273   :  { %1158 = vmatpush3.msra.mxu1 %v957_v49 }
 0x274   :  { %1159 = vmatprep.subr.mxu1 %v1197_v1 }
 0x275   :  { %1160 = vmatpush3.msra.mxu1 %v956_v58 }
 0x276   :  { %1161 = vmatprep.subr.mxu1 %v1197_v1 }
 0x277   :  { %1162 = vmatpush3.msra.mxu1 %v955_v59 }
 0x278   :  { %1164 = vmatmul.mubr.msk.f32.vlgmr.msra.gmra.mxu1 %vm571_vm5, %v803_v47 }
 0x324   :  { %v641_v60 = vpop.f32.mrf.mxu1 }
 0x326   :  { %v1139_v45 = vpop.f32.mrf.mxu1 }
 0x32e   :  { %v714_v61 = vpop.f32.mrf.mxu1 }
 0x32f   :  { %v715_v43 = vadd.f32 %v714_v61, %v641_v60 }
 0x330   :  { %v1152_v62 = vpop.f32.mrf.mxu1 }
 0x338   :  { %v879_v63 = vpop.f32.mrf.mxu1 }
 0x339   :  { %v883_v2 = vadd.f32 %v879_v63, %v715_v43 }
 0x33a   :  { %v1165_v3 = vpop.f32.mrf.mxu1 }
 0x33b   :  { %v891_v4 = vadd.f32 %v961_v0, %v883_v2 }
 0x33d   :  { %893 = vst.msk [vmem:[#allocation2] sm:$0x3] %vm892_vm6, %v891_v4 }
 0x33e   :  { %1186 = shalt.err (!%p1183_p4)
}
 0x33f   :  { %903 = dma.vmem_to_hbm [thread:$0]  %s901_s12, 32, %s1847_s6, [#allocation3]  }
 0x340   :  { %1195 = dma.done.wait [#allocation3], 32  }
 0x341   :  { %1196 = vsyncadd [#allocation3], 4294967264 }
 0x342   :  { %907 = vsyncpa [#allocation3], 1 }

</bundles_post_ra>
